<compile_context>
chip_gen: v7x
topology: tpu7x:2x2x1
jax: 0.10.0
libtpu: 0.0.40
codegen_flags: <defaults>
</compile_context>

<pallas_src>
import functools

import jax
import jax.numpy as jnp
from jax.experimental import pallas as pl
from jax.experimental.pallas import tpu as pltpu


# ----------------------------------------------------------------------------
# Kernel
# ----------------------------------------------------------------------------
def _bert_to_goal_kernel(x_ref, w_enc_ref, b_enc_ref, w_cls_ref, b_cls_ref, o_ref):
    """Fused selection_encoder + classifier head for one batch tile.

    x_ref:     [TM, in_p]            VMEM  bf16 (flattened, zero-padded selections)
    w_enc_ref: [in_p, hidden_p]      VMEM  bf16 (MXU-native [K, N] layout)
    b_enc_ref: [1, hidden_p]         VMEM  f32
    w_cls_ref: [hidden_p, out_p]     VMEM  bf16 (MXU-native [K, N] layout)
    b_cls_ref: [1, out_p]            VMEM  f32
    o_ref:     [TM, out_p]           VMEM  f32 (lane-dense, out_p % 128 == 0)
    """
    # Linear 1: bf16 x bf16 -> f32 accumulation on the MXU.
    h = jnp.dot(x_ref[...], w_enc_ref[...], preferred_element_type=jnp.float32)
    h = jnp.maximum(h + b_enc_ref[...], 0.0)          # bias + ReLU
    # Dropout: eval-mode identity (no scaling).

    # Linear 2 (classifier head): cast activation back to bf16 for the MXU.
    y = jnp.dot(h.astype(w_cls_ref.dtype), w_cls_ref[...],
                preferred_element_type=jnp.float32)
    o_ref[...] = (y + b_cls_ref[...]).astype(o_ref.dtype)


# ----------------------------------------------------------------------------
# Parameter / tiling helpers
# ----------------------------------------------------------------------------
def _round_up(x, mult):
    return ((x + mult - 1) // mult) * mult


def _pad_to(x, axis, mult):
    pad = (-x.shape[axis]) % mult
    if pad == 0:
        return x
    widths = [(0, 0)] * x.ndim
    widths[axis] = (0, pad)
    return jnp.pad(x, widths)


def prepare_params(w_enc, b_enc, w_cls, b_cls):
    """One-time (init-time) padding + transpose + bf16 cast of parameters.

    w_enc: [hidden, in_dim], b_enc: [hidden]     (native PyTorch layouts)
    w_cls: [n_out, hidden],  b_cls: [n_out]

    Returns MXU-native [K, N] bf16 weights and f32 2-D biases, all padded to
    lane-dense multiples of 128.  Padded rows/columns are zero, so the padded
    forward pass matches the unpadded one on the real output columns.
    """
    w_enc_p = _pad_to(_pad_to(w_enc, 1, 128), 0, 128).T.astype(jnp.bfloat16)  # [in_p, hidden_p]
    b_enc_p = _pad_to(b_enc, 0, 128)[None, :].astype(jnp.float32)             # [1, hidden_p]
    w_cls_p = _pad_to(_pad_to(w_cls, 1, 128), 0, 128).T.astype(jnp.bfloat16)  # [hidden_p, out_p]
    b_cls_p = _pad_to(b_cls, 0, 128)[None, :].astype(jnp.float32)             # [1, out_p]
    return w_enc_p, b_enc_p, w_cls_p, b_cls_p


def _select_tm(B, in_p, out_p):
    """Batch-tile rows.

    Tiny B: one tile (launch/step overhead dominates, nothing to pipeline).
    Larger B: at least 2 grid steps (so v7x's two TensorCores both get work),
    tm a multiple of 16 (bf16 sublane packing), with the double-buffered
    input/output tile working set budgeted against a conservative VMEM limit
    that holds across v5e / v6e / v7x.
    """
    if B <= 64:
        return B
    row_bytes = 2 * in_p * 2 + 2 * out_p * 4          # 2x bf16 in-tile + 2x f32 out-tile
    vmem_budget = 24 << 20                             # conservative across generations
    cap = max(16, (vmem_budget // row_bytes) // 16 * 16)
    tm = _round_up(pl.cdiv(B, 2), 16)                  # >= 2 grid steps
    return min(tm, cap, 1024)


# Capability probe: single-buffering of grid-invariant inputs.
_SINGLE_BUFFER_OK = None


def _single_buffer_supported() -> bool:
    """Probe (once) whether pipeline_mode=pl.Buffered(1) lowers on this JAX."""
    global _SINGLE_BUFFER_OK
    if _SINGLE_BUFFER_OK is not None:
        return _SINGLE_BUFFER_OK
    try:
        spec = pl.BlockSpec((8, 128), lambda i: (0, 0),
                            pipeline_mode=pl.Buffered(1))

        def _probe(x_ref, o_ref):
            o_ref[...] = x_ref[...] + 1.0

        fn = pl.pallas_call(
            _probe,
            out_shape=jax.ShapeDtypeStruct((16, 128), jnp.float32),
            grid=(2,),
            in_specs=[spec],
            out_specs=pl.BlockSpec((8, 128), lambda i: (i, 0)),
        )
        jax.block_until_ready(fn(jnp.zeros((8, 128), jnp.float32)))
        _SINGLE_BUFFER_OK = True
    except Exception:  # any failure -> default double-buffering
        _SINGLE_BUFFER_OK = False
    return _SINGLE_BUFFER_OK


def _param_spec(shape, single_buffer):
    """BlockSpec for a grid-invariant operand (constant block index)."""
    index_map = lambda i: (0,) * len(shape)
    if single_buffer:
        return pl.BlockSpec(shape, index_map, pipeline_mode=pl.Buffered(1))
    return pl.BlockSpec(shape, index_map)


# ----------------------------------------------------------------------------
# Forward pass
# ----------------------------------------------------------------------------
@functools.partial(
    jax.jit,
    static_argnames=("n_out", "num_goals", "return_padded", "single_buffer_params"),
)
def _forward_impl(selections, w_enc_p, b_enc_p, w_cls_p, b_cls_p, *,
                  n_out, num_goals, return_padded, single_buffer_params):
    B = selections.shape[0]
    # selections.view(B, -1).float()
    x = selections.reshape(B, -1).astype(jnp.float32)
    in_dim = x.shape[1]
    in_p, hidden_p = w_enc_p.shape
    out_p = w_cls_p.shape[1]

    # Zero-pad the feature dim to the lane-dense width baked into the weights,
    # then cast to bf16 (exact for {0,1} selections).
    if in_p != in_dim:
        x = jnp.pad(x, ((0, 0), (0, in_p - in_dim)))
    x = x.astype(jnp.bfloat16)

    tm = _select_tm(B, in_p, out_p)
    grid = (pl.cdiv(B, tm),)

    # Note: when B % tm != 0 the final tile computes on out-of-bounds rows;
    # their results are masked at store time (correct, wastes a few MXU cycles).

    # VMEM budget: double-buffered x/out tiles + single weights + temporaries,
    # with headroom; clamped to be safe on v5e (16 MiB scoped default) and
    # v7x (64 MiB physical).
    tile_bytes = (2 * tm * in_p * 2 + 2 * tm * out_p * 4
                  + in_p * hidden_p * 2 + hidden_p * out_p * 2
                  + (hidden_p + out_p) * 4
                  + tm * hidden_p * 4 + tm * out_p * 4)
    vmem_limit = int(min(48 << 20, max(24 << 20, 2 * tile_bytes)))

    cost = pl.CostEstimate(
        flops=2 * B * (in_p * hidden_p + hidden_p * out_p),
        transcendentals=0,
        bytes_accessed=(2 * (B * in_p + in_p * hidden_p + hidden_p * out_p)
                        + 4 * (hidden_p + out_p + B * out_p)),
    )

    y = pl.pallas_call(
        _bert_to_goal_kernel,
        out_shape=jax.ShapeDtypeStruct((B, out_p), jnp.float32),
        grid_spec=pltpu.PrefetchScalarGridSpec(
            num_scalar_prefetch=0,
            grid=grid,
            in_specs=[
                pl.BlockSpec((tm, in_p), lambda i: (i, 0)),           # activations
                _param_spec((in_p, hidden_p), single_buffer_params),  # enc weight [K,N]
                _param_spec((1, hidden_p), single_buffer_params),     # enc bias
                _param_spec((hidden_p, out_p), single_buffer_params), # cls weight [K,N]
                _param_spec((1, out_p), single_buffer_params),        # cls bias
            ],
            out_specs=pl.BlockSpec((tm, out_p), lambda i: (i, 0)),
        ),
        compiler_params=pltpu.CompilerParams(
            dimension_semantics=("parallel",),
            vmem_limit_bytes=vmem_limit,
        ),
        cost_estimate=cost,
    )(x, w_enc_p, b_enc_p, w_cls_p, b_cls_p)

    if return_padded:
        # Lane-dense (B, out_p) buffer; real logits in columns [:n_out].
        # Consumers that can index the padded buffer skip one HBM pass.
        return y
    return y[:, :n_out].reshape(B, num_goals, n_out // num_goals)


def bert_to_goal_forward(selections, w_enc_p, b_enc_p, w_cls_p, b_cls_p, *,
                         n_out, num_goals, return_padded=False):
    """selections: [B, ...] (3-D or 4-D, as in the PyTorch .view() branches).
    Returns [B, num_goals, n_out // num_goals] f32 goal-class logits
    (or the padded (B, out_p) buffer if return_padded=True)."""
    return _forward_impl(
        selections, w_enc_p, b_enc_p, w_cls_p, b_cls_p,
        n_out=n_out, num_goals=num_goals, return_padded=return_padded,
        single_buffer_params=_single_buffer_supported(),
    )


# ----------------------------------------------------------------------------
# Demo / correctness check
# ----------------------------------------------------------------------------
if __name__ == "__main__":
    # Shapes consistent with the module: batch=8, 4-D selections (8,3,4,4)
    # -> 48 flattened features, encoder hidden=64, 6 goals x 5 classes = 30 logits.
    B, num_goals, num_classes = 8, 6, 5
    hidden = 64
    sel_shape = (B, 3, 4, 4)
    in_dim = sel_shape[1] * sel_shape[2] * sel_shape[3]
    n_out = num_goals * num_classes

    key = jax.random.PRNGKey(0)
    k_s, k_w1, k_b1, k_w2, k_b2 = jax.random.split(key, 5)

    selections = (jax.random.uniform(k_s, sel_shape) > 0.5).astype(jnp.float32)
    w_enc = jax.random.normal(k_w1, (hidden, in_dim), jnp.float32) * 0.1
    b_enc = jax.random.normal(k_b1, (hidden,), jnp.float32) * 0.1
    w_cls = jax.random.normal(k_w2, (n_out, hidden), jnp.float32) * 0.1
    b_cls = jax.random.normal(k_b2, (n_out,), jnp.float32) * 0.1

    # One-time parameter padding + transpose + bf16 cast (model init).
    params = prepare_params(w_enc, b_enc, w_cls, b_cls)

    out = bert_to_goal_forward(selections, *params,
                               n_out=n_out, num_goals=num_goals)
    out = jax.block_until_ready(out)
    assert out.shape == (B, num_goals, num_classes)

    # Pure-JAX references.
    x = selections.reshape(B, -1)

    # (a) mirror of the kernel's bf16-operand / f32-accumulate path.
    w1 = w_enc.astype(jnp.bfloat16).astype(jnp.float32)
    w2 = w_cls.astype(jnp.bfloat16).astype(jnp.float32)
    h = jnp.maximum(x.astype(jnp.bfloat16).astype(jnp.float32) @ w1.T + b_enc, 0.0)
    ref_bf16 = (h.astype(jnp.bfloat16).astype(jnp.float32) @ w2.T + b_cls)
    ref_bf16 = ref_bf16.reshape(B, num_goals, num_classes)

    # (b) full-f32 reference of the original module forward.
    ref_f32 = (jnp.maximum(x @ w_enc.T + b_enc, 0.0) @ w_cls.T + b_cls)
    ref_f32 = ref_f32.reshape(B, num_goals, num_classes)

    assert jnp.allclose(out, ref_bf16, atol=1e-2, rtol=1e-2)
    assert jnp.allclose(out, ref_f32, atol=1e-1, rtol=1e-1)

    print("KERNEL_OK")
</pallas_src>

<mosaic_0001>
module attributes {stable_mosaic.version = 11 : i64} {
  func.func @_probe(%arg0: i32, %arg1: memref<8x128xf32, #tpu.memory_space<vmem>>, %arg2: memref<8x128xf32, #tpu.memory_space<vmem>>) attributes {dimension_semantics = [#tpu.dimension_semantics<arbitrary>], iteration_bounds = array<i64: 2>, scalar_prefetch = 0 : i64, scratch_operands = 0 : i64, tpu.core_type = #tpu.core_type<tc>, window_params = [{pipeline_mode = #tpu.pipeline_mode<synchronous>, transform_indices = @transform_0, window_bounds = array<i64: 8, 128>}, {transform_indices = @transform_1, window_bounds = array<i64: 8, 128>}]} {
    %c0 = arith.constant 0 : index
    %c0_0 = arith.constant 0 : index
    %0 = vector.load %arg1[%c0, %c0_0] : memref<8x128xf32, #tpu.memory_space<vmem>>, vector<8x128xf32>
    %cst = arith.constant 1.000000e+00 : f32
    %1 = vector.broadcast %cst : f32 to vector<8x128xf32>
    %2 = arith.addf %0, %1 : vector<8x128xf32>
    %c0_1 = arith.constant 0 : index
    %c0_2 = arith.constant 0 : index
    %3 = vector.load %arg2[%c0_1, %c0_2] : memref<8x128xf32, #tpu.memory_space<vmem>>, vector<8x128xf32>
    tpu.vector_store %arg2[%c0_1, %c0_2], %2 {strides = array<i32>} : memref<8x128xf32, #tpu.memory_space<vmem>>, vector<8x128xf32>,
    return
  }
  func.func @transform_0(%arg0: i32) -> (i32, i32) {
    %c0_i32 = arith.constant 0 : i32
    %c0_i32_0 = arith.constant 0 : i32
    %c0_i32_1 = arith.constant 0 : i32
    return %c0_i32, %c0_i32_0 : i32, i32
  }
  func.func @transform_1(%arg0: i32) -> (i32, i32) {
    %c0_i32 = arith.constant 0 : i32
    %c0_i32_0 = arith.constant 0 : i32
    return %arg0, %c0_i32 : i32, i32
  }
}

module attributes {stable_mosaic.version = 11 : i64} {
  func.func @_bert_to_goal_kernel(%arg0: i32, %arg1: memref<8x128xbf16, #tpu.memory_space<vmem>>, %arg2: memref<128x128xbf16, #tpu.memory_space<vmem>>, %arg3: memref<1x128xf32, #tpu.memory_space<vmem>>, %arg4: memref<128x128xbf16, #tpu.memory_space<vmem>>, %arg5: memref<1x128xf32, #tpu.memory_space<vmem>>, %arg6: memref<8x128xf32, #tpu.memory_space<vmem>>) attributes {dimension_semantics = [#tpu.dimension_semantics<parallel>], iteration_bounds = array<i64: 1>, scalar_prefetch = 0 : i64, scratch_operands = 0 : i64, tpu.core_type = #tpu.core_type<tc>, window_params = [{transform_indices = @transform_0, window_bounds = array<i64: 8, 128>}, {pipeline_mode = #tpu.pipeline_mode<synchronous>, transform_indices = @transform_1, window_bounds = array<i64: 128, 128>}, {pipeline_mode = #tpu.pipeline_mode<synchronous>, transform_indices = @transform_2, window_bounds = array<i64: 1, 128>}, {pipeline_mode = #tpu.pipeline_mode<synchronous>, transform_indices = @transform_3, window_bounds = array<i64: 128, 128>}, {pipeline_mode = #tpu.pipeline_mode<synchronous>, transform_indices = @transform_4, window_bounds = array<i64: 1, 128>}, {transform_indices = @transform_5, window_bounds = array<i64: 8, 128>}]} {
    %c0 = arith.constant 0 : index
    %c0_0 = arith.constant 0 : index
    %0 = vector.load %arg1[%c0, %c0_0] : memref<8x128xbf16, #tpu.memory_space<vmem>>, vector<8x128xbf16>
    %c0_1 = arith.constant 0 : index
    %c0_2 = arith.constant 0 : index
    %1 = vector.load %arg2[%c0_1, %c0_2] : memref<128x128xbf16, #tpu.memory_space<vmem>>, vector<128x128xbf16>
    %cst = arith.constant dense<0.000000e+00> : vector<8x128xf32>
    %2 = tpu.matmul %0, %1, %cst {dimension_numbers = #tpu.dot_dimension_numbers<[1], [0], [0], [1], [0, 0, 1, 1], [], []>} : vector<8x128xbf16>, vector<128x128xbf16>, vector<8x128xf32> -> vector<8x128xf32>
    %c0_3 = arith.constant 0 : index
    %c0_4 = arith.constant 0 : index
    %3 = vector.load %arg3[%c0_3, %c0_4] : memref<1x128xf32, #tpu.memory_space<vmem>>, vector<1x128xf32>
    %4 = vector.broadcast %3 : vector<1x128xf32> to vector<8x128xf32>
    %5 = arith.addf %2, %4 : vector<8x128xf32>
    %cst_5 = arith.constant 0.000000e+00 : f32
    %6 = vector.broadcast %cst_5 : f32 to vector<8x128xf32>
    %7 = arith.maximumf %5, %6 : vector<8x128xf32>
    %8 = arith.truncf %7 : vector<8x128xf32> to vector<8x128xbf16>
    %c0_6 = arith.constant 0 : index
    %c0_7 = arith.constant 0 : index
    %9 = vector.load %arg4[%c0_6, %c0_7] : memref<128x128xbf16, #tpu.memory_space<vmem>>, vector<128x128xbf16>
    %cst_8 = arith.constant dense<0.000000e+00> : vector<8x128xf32>
    %10 = tpu.matmul %8, %9, %cst_8 {dimension_numbers = #tpu.dot_dimension_numbers<[1], [0], [0], [1], [0, 0, 1, 1], [], []>} : vector<8x128xbf16>, vector<128x128xbf16>, vector<8x128xf32> -> vector<8x128xf32>
    %c0_9 = arith.constant 0 : index
    %c0_10 = arith.constant 0 : index
    %11 = vector.load %arg5[%c0_9, %c0_10] : memref<1x128xf32, #tpu.memory_space<vmem>>, vector<1x128xf32>
    %12 = vector.broadcast %11 : vector<1x128xf32> to vector<8x128xf32>
    %13 = arith.addf %10, %12 : vector<8x128xf32>
    %c0_11 = arith.constant 0 : index
    %c0_12 = arith.constant 0 : index
    %14 = vector.load %arg6[%c0_11, %c0_12] : memref<8x128xf32, #tpu.memory_space<vmem>>, vector<8x128xf32>
    tpu.vector_store %arg6[%c0_11, %c0_12], %13 {strides = array<i32>} : memref<8x128xf32, #tpu.memory_space<vmem>>, vector<8x128xf32>,
    return
  }
  func.func @transform_0(%arg0: i32) -> (i32, i32) {
    %c0_i32 = arith.constant 0 : i32
    %c0_i32_0 = arith.constant 0 : i32
    return %arg0, %c0_i32 : i32, i32
  }
  func.func @transform_1(%arg0: i32) -> (i32, i32) {
    %c0_i32 = arith.constant 0 : i32
    %c0_i32_0 = arith.constant 0 : i32
    %c0_i32_1 = arith.constant 0 : i32
    return %c0_i32, %c0_i32_0 : i32, i32
  }
  func.func @transform_2(%arg0: i32) -> (i32, i32) {
    %c0_i32 = arith.constant 0 : i32
    %c0_i32_0 = arith.constant 0 : i32
    %c0_i32_1 = arith.constant 0 : i32
    return %c0_i32, %c0_i32_0 : i32, i32
  }
  func.func @transform_3(%arg0: i32) -> (i32, i32) {
    %c0_i32 = arith.constant 0 : i32
    %c0_i32_0 = arith.constant 0 : i32
    %c0_i32_1 = arith.constant 0 : i32
    return %c0_i32, %c0_i32_0 : i32, i32
  }
  func.func @transform_4(%arg0: i32) -> (i32, i32) {
    %c0_i32 = arith.constant 0 : i32
    %c0_i32_0 = arith.constant 0 : i32
    %c0_i32_1 = arith.constant 0 : i32
    return %c0_i32, %c0_i32_0 : i32, i32
  }
  func.func @transform_5(%arg0: i32) -> (i32, i32) {
    %c0_i32 = arith.constant 0 : i32
    %c0_i32_0 = arith.constant 0 : i32
    return %arg0, %c0_i32 : i32, i32
  }
}

</mosaic_0001>

<bundles_post_ra>
// kernel: tpu_custom_call.1
= control target key start
LH: loop header
LB: loop body
LE: loop exit
PB: predicated region body
PF: predicated region fallthrough
CT: control target
= control target key end

     0   :  { %6 = vsyncpa [#allocation3], 0  ;;  %s482_s0 = inlined_call_operand.hbm [shape: f32[8,128], index: 0, kind: input, shape index: {}]   ;;  %s483_s1 = inlined_call_operand.hbm [shape: f32[16,128], index: 1, kind: output, shape index: {}]  }
   0x1   :  { %7 = vsyncpa [#allocation4], 0 }
   0x2   :  { %9 = vsyncpa [#allocation4 + $0x1], 0  ;;  %s352_s6 = smov 0   ;;  %s354_s7 = smov 0  }
   0x3   :  { %s356_s8 = smov 0   ;;  %s358_s9 = smov 0  }
   0x4 LB: > { %s373_s10 = sadd.s32 4294967295, %s338_s9   ;;  %s184_s11 = sadd.s32 4294967294, %s338_s9   ;;  %s338_s9 = sphi %s358_s9, %s499_s9   ;;  %s334_s8 = sphi %s356_s8, %s498_s8   ;;  %s330_s7 = sphi %s354_s7, %s497_s7   ;;  %s326_s6 = sphi %s352_s6, %s496_s6  }
   0x5   : > { %s377_s12 = sadd.s32 1, %s338_s9   ;;  %s43_s13 = sadd.s32 1, %s334_s8 }
   0x6   : > { %s40_s14 = ssub.s32 %s338_s9, %s377_s12  ;;  %p53_p0 = scmp.ne.s32.totalorder %s334_s8, %s330_s7 }
   0x7   : > { %p41_p1 = scmp.eq.s32.totalorder %s40_s14, 0  ;;  %p54_p2 = scmp.eq.s32.totalorder %s373_s10, 1 }
   0x8   : > { %p59_p3 = scmp.ne.s32.totalorder %s330_s7, %s326_s6  ;;  %p60_p4 = scmp.eq.s32.totalorder %s184_s11, 1 }
   0x9   : > { %s388_s15 = scalar_select %p41_p1, %s334_s8, %s43_s13  }
   0xa   : > { %p390_p5 = por %p54_p2, %p53_p0  ;;  %p394_p6 = por %p60_p4, %p59_p3 }
   0xb   : > { %p185_p7 = scmp.ge.s32.totalorder %s338_s9, 1  ;;  %p67_p8 = scmp.lt.s32.totalorder %s338_s9, 3 }
   0xc   : > { %s487_s16 = scalar_select %p390_p5, 1, 0 }
   0xd   : > { %s488_s17 = scalar_select %p394_p6, 1, 0 }
   0xe   : > { %p484_p9 = scmp.eq.s32.totalorder %s373_s10, 0  ;;  %p401_p10 = pnand %p185_p7, %p67_p8 }
   0xf   : > { %s340_s19 = smov [#allocation2]   ;;  %s244_s24 = scalar_lea.hbm %s482_s0, 128 }
  0x10   : > { %s489_s18 = scalar_select %p401_p10, 1, 0 }
  0x11   : > { %s80_s20 = sshll.u32 %s340_s19, 4  ;;  %p200_p11 = pneg %p401_p10  ;;  %s81_s20 = int_to_ptr.vmem [resolvable:$true] %s80_s20 }
  0x12   : > { %p245_p13 = scmp.ne.s32.totalorder %s482_s0, %s244_s24  ;;  %p251_p3 = scmp.lt.u32.totalorder %s244_s24, %s482_s0 }
  0x13   : > { %p409_p12 = pnand %p484_p9, %p200_p11 }
  0x15   : > { %p246_p0 = pneg %p409_p12 }
  0x17   : > { %p247_p1 = pnand %p246_p0, %p245_p13 }
  0x19   : > { %p248_p2 = pneg %p247_p1 }
  0x1b   : > { %p253_p4 = pnand %p251_p3, %p248_p2 }
  0x1d   : > { %256 = shalt.err (!%p253_p4)
}
  0x1e   : > { %s257_s29 = scalar_lea.vmem %s81_s20, 128  ;;  %p265_p9 = scmp.lt.s32.totalorder %s81_s20, %s81_s20 }
  0x1f   : > { %p258_p7 = scmp.ne.s32.totalorder %s81_s20, %s257_s29  ;;  %p266_p6 = scmp.lt.s32.totalorder %s257_s29, %s257_s29 }
  0x21   : > { %p260_p8 = pnand %p258_p7, %p246_p0  ;;  %p267_p5 = por %p266_p6, %p265_p9 }
  0x23   : > { %p261_p11 = pneg %p260_p8 }
  0x25   : > { %p268_p10 = pnand %p267_p5, %p261_p11 }
  0x27   : > { %271 = shalt.err (!%p268_p10)
}
  0x28   : > { %203 = dma.hbm_to_vmem [thread:$0]  (!%p409_p12), %s482_s0, 128, %s81_s20, [#allocation3]  }
  0x29   : > { %p491_p13 = scmp.ne.s32.totalorder %s489_s18, 0 }
  0x2a   : > { %p492_p1 = scmp.eq.s32.totalorder (!%p491_p13), %s373_s10, 0 }
  0x2b   : > { %93 = sbr.rel (%p491_p13) target bundleno = 77 (0x4d), region = 24 }
  0x32   : > { %317 = dma.done.wait (%p492_p1), [#allocation3], 128   ;;  %p493_p0 = pmov %p492_p1 }
  0x33   : > { %s105_s3 = sand.u32 1, %s330_s7   ;;  %s191_s13 = sshll.u32 %s373_s10, 7  ;;  %v108_v0 = vld [vmem:[#allocation2] sm:$0xff] }
  0x34   : > { %319 = vsyncadd (%p493_p0), [#allocation3], 4294967168  ;;  %s189_s4 = sshll.u32 %s105_s3, 3  ;;  %v109_v1 = vadd.f32 1.0, %v108_v0  ;;  %s442_s19 = scalar_lea.hbm %s483_s1, %s191_s13 }
  0x35   : > { %s107_s5 = scalar_lea.vmem [#allocation5], %s189_s4  ;;  %s112_s20 = scalar_lea.sflag [#allocation4], %s105_s3 }
  0x36   : > { %s125_s11 = sshll.u32 %s107_s5, 4  ;;  %110 = vst [vmem:[%s107_s5] sm:$0xff] %v109_v1  ;;  %p494_p6 = scmp.ne.s32.totalorder %s487_s16, 0  ;;  %s437_s11 = int_to_ptr.vmem [resolvable:$true] %s125_s11 }
  0x37   : > { %s272_s21 = scalar_lea.vmem %s437_s11, 128  ;;  %s341_s10 = smov [#allocation5]  }
  0x38   : > { %p273_p5 = scmp.ne.s32.totalorder %s437_s11, %s272_s21  ;;  %s276_s22 = sshll.u32 %s341_s10, 4  ;;  %s277_s22 = int_to_ptr.vmem [resolvable:$false] %s276_s22 }
  0x39   : > { %s278_s23 = scalar_lea.vmem %s277_s22, 256  ;;  %p279_p12 = scmp.lt.s32.totalorder %s437_s11, %s277_s22 }
  0x3a   : > { %p274_p9 = pnand %p273_p5, %p494_p6  ;;  %p280_p2 = scmp.lt.s32.totalorder %s278_s23, %s272_s21 }
  0x3c   : > { %p275_p10 = pneg %p274_p9  ;;  %p281_p3 = por %p280_p2, %p279_p12 }
  0x3e   : > { %p282_p4 = pnand %p281_p3, %p275_p10 }
  0x40   : > { %285 = shalt.err (!%p282_p4)
}
  0x41   : > { %s286_s24 = scalar_lea.hbm %s442_s19, 128  ;;  %s290_s27 = scalar_lea.hbm %s483_s1, 256 }
  0x42   : > { %p287_p7 = scmp.ne.s32.totalorder %s442_s19, %s286_s24  ;;  %p291_p13 = scmp.lt.u32.totalorder %s442_s19, %s483_s1 }
  0x43   : > { %p292_p1 = scmp.lt.u32.totalorder %s290_s27, %s286_s24  ;;  %p294_p5 = scmp.lt.u32.totalorder %s286_s24, %s442_s19 }
  0x44   : > { %p288_p8 = pnand %p287_p7, %p494_p6 }
  0x45   : > { %p293_p0 = por %p292_p1, %p291_p13 }
  0x46   : > { %p289_p11 = pneg %p288_p8 }
  0x47   : > { %p295_p9 = por %p294_p5, %p293_p0 }
  0x49   : > { %p296_p10 = pnand %p295_p9, %p289_p11 }
  0x4b   : > { %299 = shalt.err (!%p296_p10)
}
  0x4c   : > { %198 = dma.vmem_to_hbm [thread:$0]  (%p494_p6), %s437_s11, 128, %s442_s19, %s112_s20  }
  0x4d PF: > { %p210_p12 = scmp.ge.s32.totalorder %s338_s9, 2  ;;  %s137_s30 = sand.u32 1, %s326_s6  }
  0x4e   : > { %p495_p2 = scmp.ne.s32.totalorder %s488_s17, 0  ;;  %s138_s2 = scalar_lea.sflag [#allocation4], %s137_s30 }
  0x50   : > { %p205_p3 = pnand %p210_p12, %p495_p2 }
  0x52   : > { %321 = dma.done.wait (!%p205_p3), %s138_s2, 128  }
  0x53   : > { %323 = vsyncadd (!%p205_p3), %s138_s2, 4294967168  ;;  %p12_p4 = scmp.ge.s32.totalorder %s377_s12, 4   ;;  %s496_s6 = smov %s330_s7 }
  0x54   : > { %s497_s7 = smov %s334_s8  ;;  %s498_s8 = smov %s388_s15 }
  0x55   : > { %s499_s9 = smov %s377_s12  ;;  %14 = sbr.rel (!%p12_p4) target bundleno = 4 (0x4), region = 61 }
  0x5c   :  { %143 = vsyncpa [#allocation3], 1 }
  0x5d   :  { %145 = vsyncpa [#allocation3 + $0x1], 1 }
  0x5e   :  { %146 = vsyncpa [#allocation4], 1 }
  0x5f   :  { %148 = vsyncpa [#allocation4 + $0x1], 1 }

// kernel: _forward_impl.1
= control target key start
LH: loop header
LB: loop body
LE: loop exit
PB: predicated region body
PF: predicated region fallthrough
CT: control target
= control target key end

     0   :  { %10 = vsyncpa [#allocation3], 0  ;;  %s387_s18 = smov [#allocation2]   ;;  %s470_s0 = inlined_call_operand.vmem [shape: bf16[8,128], index: 0, kind: input, shape index: {}]   ;;  %s471_s1 = inlined_call_operand.vmem [shape: bf16[128,128], index: 1, kind: input, shape index: {}]   ;;  %s472_s2 = inlined_call_operand.vmem [shape: f32[1,128], index: 2, kind: input, shape index: {}]   ;;  %s473_s3 = inlined_call_operand.hbm [shape: bf16[128,128], index: 3, kind: input, shape index: {}]   ;;  %s474_s4 = inlined_call_operand.vmem [shape: f32[1,128], index: 4, kind: input, shape index: {}]   ;;  %s475_s5 = inlined_call_operand.vmem [shape: f32[8,128], index: 5, kind: output, shape index: {}]  }
   0x1   :  { %s22_s19 = sshll.u32 %s387_s18, 4  ;;  %s363_s22 = scalar_lea.hbm %s473_s3, 1024  ;;  %s23_s19 = int_to_ptr.vmem [resolvable:$true] %s22_s19 }
   0x2   :  { %p364_p0 = scmp.ne.s32.totalorder %s473_s3, %s363_s22  ;;  %p367_p1 = scmp.lt.u32.totalorder %s363_s22, %s473_s3 }
   0x4   :  { %p369_p2 = pnand %p367_p1, %p364_p0 }
   0x6   :  { %372 = shalt.err (!%p369_p2)
}
   0x7   :  { %s373_s27 = scalar_lea.vmem %s23_s19, 1024  ;;  %p378_p4 = scmp.lt.s32.totalorder %s23_s19, %s23_s19 }
   0x8   :  { %p374_p3 = scmp.ne.s32.totalorder %s23_s19, %s373_s27  ;;  %p379_p5 = scmp.lt.s32.totalorder %s373_s27, %s373_s27 }
   0xa   :  { %p380_p6 = por %p379_p5, %p378_p4 }
   0xc   :  { %p381_p7 = pnand %p380_p6, %p374_p3 }
   0xe   :  { %384 = shalt.err (!%p381_p7)
}
   0xf   :  { %s388_s28 = smov 64   ;;  %s389_s29 = smov 4  }
  0x10   :  { %28 = dma.hbm_to_vmem [thread:$0]  %s473_s3, 1024, %s23_s19, [#allocation3], %s388_s28, %s388_s28, %s389_s29  }
  0x11   :  { %385 = dma.done.wait [#allocation3], 1024  }
  0x12   :  { %386 = vsyncadd [#allocation3], 4294966272  ;;  %v390_v0 = vmov 0.0   ;;  %vm391_vm0 = vmmov 0   ;;  %v347_v1 = vld [vmem:[%s471_s1] sm:$0xff]   ;;  %v348_v2 = vld [vmem:[%s471_s1 + $0x8] sm:$0xff]  }
  0x13   :  { %302 = vmatprep.subr.bf16.mxu0 %v390_v0  ;;  %318 = vmatprep.mubr.msk.bf16.mxu0 %vm391_vm0, %v390_v0  ;;  %v349_v3 = vld [vmem:[%s471_s1 + $0x10] sm:$0xff]   ;;  %v355_v4 = vld [vmem:[#allocation2] sm:$0xff]   ;;  %v350_v5 = vld [vmem:[%s471_s1 + $0x18] sm:$0xff]  }
  0x14   :  { %322 = vmatprep.subr.bf16.mxu1 %v390_v0  ;;  %338 = vmatprep.mubr.msk.bf16.mxu1 %vm391_vm0, %v390_v0  ;;  %v356_v6 = vld [vmem:[#allocation2 + $0x8] sm:$0xff]   ;;  %v351_v7 = vld [vmem:[%s471_s1 + $0x20] sm:$0xff]   ;;  %v357_v8 = vld [vmem:[#allocation2 + $0x10] sm:$0xff]  }
  0x15   :  { %303 = vmatpush3.bf16.msra.mxu0 %v347_v1  ;;  %323 = vmatpush3.bf16.msra.mxu1 %v355_v4  ;;  %v352_v9 = vld [vmem:[%s471_s1 + $0x28] sm:$0xff]   ;;  %v358_v10 = vld [vmem:[#allocation2 + $0x18] sm:$0xff]   ;;  %v353_v11 = vld [vmem:[%s471_s1 + $0x30] sm:$0xff]  }
  0x16   :  { %304 = vmatprep.subr.bf16.mxu0 %v390_v0  ;;  %324 = vmatprep.subr.bf16.mxu1 %v390_v0  ;;  %v359_v12 = vld [vmem:[#allocation2 + $0x20] sm:$0xff]   ;;  %v354_v13 = vld [vmem:[%s471_s1 + $0x38] sm:$0xff]   ;;  %v360_v14 = vld [vmem:[#allocation2 + $0x28] sm:$0xff]  }
  0x17   :  { %v35_v15 = vld [vmem:[%s470_s0] sm:$0xf]  ;;  %v361_v16 = vld [vmem:[#allocation2 + $0x30] sm:$0xff]   ;;  %v362_v17 = vld [vmem:[#allocation2 + $0x38] sm:$0xff]  }
  0x18   :  { %v266_v18 = vld [vmem:[%s472_s2] ss:$0 sm:$0xff] }
  0x19   :  { %305 = vmatpush3.bf16.msra.mxu0 %v348_v2  ;;  %325 = vmatpush3.bf16.msra.mxu1 %v356_v6  ;;  %v275_v26 = vld [vmem:[%s474_s4] ss:$0 sm:$0xff] }
  0x1a   :  { %306 = vmatprep.subr.bf16.mxu0 %v390_v0  ;;  %326 = vmatprep.subr.bf16.mxu1 %v390_v0 }
  0x1d   :  { %307 = vmatpush3.bf16.msra.mxu0 %v349_v3  ;;  %327 = vmatpush3.bf16.msra.mxu1 %v357_v8 }
  0x1e   :  { %308 = vmatprep.subr.bf16.mxu0 %v390_v0  ;;  %328 = vmatprep.subr.bf16.mxu1 %v390_v0 }
  0x21   :  { %309 = vmatpush3.bf16.msra.mxu0 %v350_v5  ;;  %329 = vmatpush3.bf16.msra.mxu1 %v358_v10 }
  0x22   :  { %310 = vmatprep.subr.bf16.mxu0 %v390_v0  ;;  %330 = vmatprep.subr.bf16.mxu1 %v390_v0 }
  0x25   :  { %311 = vmatpush3.bf16.msra.mxu0 %v351_v7  ;;  %331 = vmatpush3.bf16.msra.mxu1 %v359_v12 }
  0x26   :  { %312 = vmatprep.subr.bf16.mxu0 %v390_v0  ;;  %332 = vmatprep.subr.bf16.mxu1 %v390_v0 }
  0x29   :  { %313 = vmatpush3.bf16.msra.mxu0 %v352_v9  ;;  %333 = vmatpush3.bf16.msra.mxu1 %v360_v14 }
  0x2a   :  { %314 = vmatprep.subr.bf16.mxu0 %v390_v0  ;;  %334 = vmatprep.subr.bf16.mxu1 %v390_v0 }
  0x2d   :  { %315 = vmatpush3.bf16.msra.mxu0 %v353_v11  ;;  %335 = vmatpush3.bf16.msra.mxu1 %v361_v16 }
  0x2e   :  { %316 = vmatprep.subr.bf16.mxu0 %v390_v0  ;;  %336 = vmatprep.subr.bf16.mxu1 %v390_v0 }
  0x31   :  { %317 = vmatpush3.bf16.msra.mxu0 %v354_v13  ;;  %337 = vmatpush3.bf16.msra.mxu1 %v362_v17 }
  0x34   :  { %319 = vmatmul.mubr.bf16.vlgmr.msra.gmra.mrb[0].mxu0 %v35_v15 }
 0x107   :  { %v141_v19 = vpop.f32.mrb[0].mxu0 }
 0x108   :  { %v142_v20 = vadd.f32 %v266_v18, %v141_v19  ;;  %v320_v21 = vpop.f32.mrb[1].mxu0 }
 0x109   :  { %v144_v22 = vpop.f32.mrb[2].mxu0 }
 0x10a   :  { %v147_v23 = vmax.f32 %v142_v20, 0.0  ;;  %v321_v24 = vpop.f32.mrb[3].mxu0 }
 0x10c   :  { %v148_v25 = vpack.c.bf16 %v147_v23, %v147_v23 }
 0x10e   :  { %339 = vmatmul.mubr.bf16.vlgmr.msra.gmra.mrb[0].mxu1 %v148_v25 }
 0x1e1   :  { %v254_v27 = vpop.f32.mrb[0].mxu1 }
 0x1e2   :  { %v255_v28 = vadd.f32 %v275_v26, %v254_v27  ;;  %v340_v29 = vpop.f32.mrb[1].mxu1 }
 0x1e3   :  { %v257_v30 = vpop.f32.mrb[2].mxu1 }
 0x1e4   :  { %260 = vst [vmem:[%s475_s5] sm:$0xff] %v255_v28  ;;  %v341_v31 = vpop.f32.mrb[3].mxu1 }
 0x1e5   :  { %265 = vsyncpa [#allocation3], 1 }

</bundles_post_ra>
